<compile_context>
chip_gen: v5e
topology: v5e:2x2
jax: 0.10.0
libtpu: 0.0.40
codegen_flags: <defaults>
</compile_context>

<pallas_src>
import jax
import jax.numpy as jnp
from jax.experimental import pallas as pl
from jax.experimental.pallas import tpu as pltpu


def _attn_with_fit_kernel(w1_ref,      # (1,)         SMEM f32: softmax(F)[1]
                          rowco_ref,   # (bt, tq, 2)  VMEM f32: [slope_i, offset_i]
                          fcols_ref,   # (bt, 1,  N)  VMEM f32: fitx, lane-dense
                          attn_ref,    # (tq, N)      VMEM bf16: w0 * softmax(attn)
                          x_ref,       # (bt, N,  D)  VMEM bf16
                          o_ref):      # (bt, tq, D)  VMEM f32
    w1 = w1_ref[0]

    ro = rowco_ref[...]                               # (bt, tq, 2)
    slope = ro[:, :, 0:1]                             # (bt, tq, 1)  a1*f_i + a3
    offset = ro[:, :, 1:2]                            # (bt, tq, 1)  a2*f_i + a4 - rowmax_i
    f_cols = fcols_ref[...]                           # (bt, 1,  N)

    # Shifted scores: one VPU FMA per element.  The row-max is already folded
    # into `offset` analytically, so there is no cross-lane max reduce here.
    s = slope * f_cols + offset                       # (bt, tq, N) f32, <= ~0
    p = jnp.exp(s)                                    # EUP
    l = jnp.sum(p, axis=-1, keepdims=True)            # (bt, tq, 1)  XLU row-sum
    # w1 / l via the EUP reciprocal (approx) — off the VALU critical slot.
    inv = (w1 * pl.reciprocal(l, approx=True)).astype(jnp.bfloat16)

    # Fused attention matrix in bf16: w0*softmax(attn) + w1*softmax(scores).
    combined = attn_ref[...] + p.astype(jnp.bfloat16) * inv      # (bt, tq, N)

    # Single fused (tq,N)@(N,D) matmul per batch element, bf16 in / f32 acc.
    y = jnp.einsum('bqn,bnd->bqd', combined, x_ref[...],
                   preferred_element_type=jnp.float32)
    o_ref[...] = y.astype(o_ref.dtype)


def attn_with_fit(x, fitx, attn_param, wq, bq, wk, bk, F, *, bt=None, tq=None):
    """Pallas implementation of AttnWithFit.forward.

    x:          (B, N, D) f32      fitx: (B, N, 1) f32
    attn_param: (1, N, N) f32      wq/wk: (H, 1) f32   bq/bk: (H,) f32   F: (2,) f32
    """
    B, N, D = x.shape
    scale = float(D) ** (-0.5)     # matches PyTorch: x.shape[-1] ** -0.5

    # ------------- batch-invariant precompute (plain JAX, once per call) ----
    w = jax.nn.softmax(F.astype(jnp.float32))                            # (2,)
    attn_pre = (w[0] * jax.nn.softmax(attn_param[0].astype(jnp.float32),
                                      axis=-1)).astype(jnp.bfloat16)     # (N,N) bf16

    wqv = wq[:, 0].astype(jnp.float32)
    wkv = wk[:, 0].astype(jnp.float32)
    bqv = bq.astype(jnp.float32)
    bkv = bk.astype(jnp.float32)
    # q@k^T = a1*f_i*f_j + a2*f_i + a3*f_j + a4   (hidden dim collapses).
    a1 = jnp.dot(wqv, wkv) * scale
    a2 = jnp.dot(wqv, bkv) * scale
    a3 = jnp.dot(bqv, wkv) * scale
    a4 = jnp.dot(bqv, bkv) * scale

    f = fitx[:, :, 0].astype(jnp.float32)                                # (B, N)
    slope = a1 * f + a3                                                  # (B, N)
    base = a2 * f + a4                                                   # (B, N)
    # Analytic per-row softmax max: s_ij is affine in f_j, so its max over j
    # sits at the TRUE per-batch min/max of fitx (not per-tile) — safe vs exp
    # overflow for any tiling.
    f_min = jnp.min(f, axis=1, keepdims=True)                            # (B, 1)
    f_max = jnp.max(f, axis=1, keepdims=True)
    row_max = jnp.maximum(slope * f_max + base, slope * f_min + base)    # (B, N)
    rowco = jnp.stack([slope, base - row_max], axis=-1)                  # (B, N, 2)

    fcols = jnp.swapaxes(fitx.astype(jnp.float32), 1, 2)                 # (B, 1, N)
    x_bf16 = x.astype(jnp.bfloat16)
    w1 = w[1:2]                                                          # (1,) f32

    # ------------- generation-aware tile selection ---------------------------
    try:
        vmem_cap = int(pltpu.get_tpu_info().vmem_capacity_bytes)
    except Exception:
        vmem_cap = 64 << 20            # conservative default (v7x per-core VMEM)
    tile_budget = vmem_cap // 2        # target for resident blocks + intermediates
    vmem_limit = min((vmem_cap * 3) // 4, 112 << 20)

    def _rup(v, m):
        return ((v + m - 1) // m) * m

    def resident(bt_, tq_):
        # Double-buffered pipelined blocks, with lane (128) / sublane padding.
        rowco_b = bt_ * _rup(tq_, 8) * 128 * 4            # (bt,tq,2) f32 -> 128 lanes
        fcols_b = bt_ * 8 * _rup(N, 128) * 4              # (bt,1,N)  f32
        attn_b = _rup(tq_, 16) * _rup(N, 128) * 2         # (tq,N)    bf16
        x_b = bt_ * _rup(N, 16) * _rup(D, 128) * 2        # (bt,N,D)  bf16
        out_b = bt_ * _rup(tq_, 8) * _rup(D, 128) * 4     # (bt,tq,D) f32
        blocks = 2 * (rowco_b + fcols_b + attn_b + x_b + out_b)
        # ~3 live f32 (bt,tq,N) softmax / blend intermediates dominate for D<<N.
        inter = 3 * bt_ * _rup(tq_, 8) * _rup(N, 128) * 4
        return blocks + inter

    if tq is None:
        tq = N
        if resident(1, N) > tile_budget:
            for t in range((N // 16) * 16, 15, -16):      # bf16-safe row tiles
                if N % t == 0 and resident(1, t) <= tile_budget:
                    tq = t
                    break
            # If N has no suitable divisor we fall back to whole rows (tq=N);
            # a flash-style column-tiled path would be needed for N >> 1e4.
    if bt is None:
        bt = 1
        for cand in range(B, 0, -1):
            if B % cand == 0 and resident(cand, tq) <= tile_budget:
                bt = cand
                break

    # Guarantee >= 2 grid steps whenever possible so both v7x cores get work.
    if (B // bt) * (N // tq) < 2:
        if B > 1:
            bt = next(c for c in range(bt - 1, 0, -1) if B % c == 0)
        elif tq > 16:
            for t in range(tq - 16, 15, -16):
                if N % t == 0:
                    tq = t
                    break

    n_b, n_r = B // bt, N // tq

    # ------------- grid ordering: minimise redundant HBM re-streaming --------
    # batch-outer re-streams attn_pre (n_b-1) times; row-outer re-streams x
    # (n_r-1) times.  Pick whichever redundant stream is smaller.
    attn_restream = (n_b - 1) * N * N * 2
    x_restream = (n_r - 1) * B * N * D * 2
    b_outer = attn_restream <= x_restream
    if b_outer:
        grid = (n_b, n_r)
        b_of = lambda i, j: i
        r_of = lambda i, j: j
    else:
        grid = (n_r, n_b)
        b_of = lambda i, j: j
        r_of = lambda i, j: i

    cost = pl.CostEstimate(
        flops=2 * B * N * N * D + 6 * B * N * N,
        transcendentals=B * N * N,
        bytes_accessed=(N * N * 2            # attn_pre (bf16)
                        + B * N * D * 2      # x (bf16)
                        + B * N * D * 4      # out (f32)
                        + B * N * (2 * 4 + 4)),
    )

    return pl.pallas_call(
        _attn_with_fit_kernel,
        out_shape=jax.ShapeDtypeStruct((B, N, D), x.dtype),
        grid=grid,
        in_specs=[
            pl.BlockSpec(memory_space=pltpu.MemorySpace.SMEM),            # w1
            pl.BlockSpec((bt, tq, 2), lambda i, j: (b_of(i, j), r_of(i, j), 0)),
            pl.BlockSpec((bt, 1, N), lambda i, j: (b_of(i, j), 0, 0)),
            pl.BlockSpec((tq, N), lambda i, j: (r_of(i, j), 0)),          # bf16
            pl.BlockSpec((bt, N, D), lambda i, j: (b_of(i, j), 0, 0)),    # bf16
        ],
        out_specs=pl.BlockSpec((bt, tq, D),
                               lambda i, j: (b_of(i, j), r_of(i, j), 0)),
        compiler_params=pltpu.CompilerParams(
            dimension_semantics=("parallel", "parallel"),
            vmem_limit_bytes=vmem_limit),
        cost_estimate=cost,
    )(w1, rowco, fcols, attn_pre, x_bf16)


def _reference(x, fitx, attn_param, wq, bq, wk, bk, F):
    """Pure-JAX f32 reference matching the PyTorch forward."""
    D = x.shape[-1]
    q = fitx @ wq.T + bq                                    # (B, N, H)
    k = fitx @ wk.T + bk                                    # (B, N, H)
    s = jnp.einsum('bnh,bmh->bnm', q, k) * (D ** (-0.5))    # (B, N, N)
    fitattn = jax.nn.softmax(s, axis=-1)
    attn_sm = jax.nn.softmax(attn_param, axis=-1)           # (1, N, N)
    y1 = attn_sm @ x
    y2 = fitattn @ x
    w = jax.nn.softmax(F)
    return y1 * w[0] + y2 * w[1]


if __name__ == "__main__":
    # Small synthetic shapes consistent with the module's forward.
    B, N, D, H = 2, 8, 16, 32      # popSize=N, hiddenDim=H, problem dim=D

    key = jax.random.PRNGKey(0)
    ks = jax.random.split(key, 8)

    x = jax.random.normal(ks[0], (B, N, D), dtype=jnp.float32)
    fitx = jax.random.normal(ks[1], (B, N, 1), dtype=jnp.float32)

    attn_param = jax.random.normal(ks[2], (1, N, N), dtype=jnp.float32)
    wq = jax.random.normal(ks[3], (H, 1), dtype=jnp.float32) * 0.5
    bq = jax.random.normal(ks[4], (H,), dtype=jnp.float32) * 0.1
    wk = jax.random.normal(ks[5], (H, 1), dtype=jnp.float32) * 0.5
    bk = jax.random.normal(ks[6], (H,), dtype=jnp.float32) * 0.1
    F = jax.random.normal(ks[7], (2,), dtype=jnp.float32)

    y = attn_with_fit(x, fitx, attn_param, wq, bq, wk, bk, F)
    y = jax.block_until_ready(y)

    y_ref = _reference(x, fitx, attn_param, wq, bq, wk, bk, F)
    assert y.shape == (B, N, D)
    # bf16 attention probabilities / matmul + approx reciprocal -> relaxed tol.
    assert jnp.allclose(y, y_ref, atol=2e-2, rtol=2e-2), "mismatch vs reference"

    print("KERNEL_OK")
</pallas_src>

<mosaic_0001>
module attributes {stable_mosaic.version = 11 : i64} {
  func.func @_attn_with_fit_kernel(%arg0: i32, %arg1: i32, %arg2: memref<1xf32, #tpu.memory_space<smem>>, %arg3: memref<1x8x2xf32, #tpu.memory_space<vmem>>, %arg4: memref<1x1x8xf32, #tpu.memory_space<vmem>>, %arg5: memref<8x8xbf16, #tpu.memory_space<vmem>>, %arg6: memref<1x8x16xbf16, #tpu.memory_space<vmem>>, %arg7: memref<1x8x16xf32, #tpu.memory_space<vmem>>) attributes {dimension_semantics = [#tpu.dimension_semantics<parallel>, #tpu.dimension_semantics<parallel>], iteration_bounds = array<i64: 1, 2>, scalar_prefetch = 0 : i64, scratch_operands = 0 : i64, tpu.core_type = #tpu.core_type<tc>, window_params = [{transform_indices = @transform_0, window_bounds = array<i64: 1>}, {transform_indices = @transform_1, window_bounds = array<i64: 1, 8, 2>}, {transform_indices = @transform_2, window_bounds = array<i64: 1, 1, 8>}, {transform_indices = @transform_3, window_bounds = array<i64: 8, 8>}, {transform_indices = @transform_4, window_bounds = array<i64: 1, 8, 16>}, {transform_indices = @transform_5, window_bounds = array<i64: 1, 8, 16>}]} {
    %c0 = arith.constant 0 : index
    %0 = memref.load %arg2[%c0] : memref<1xf32, #tpu.memory_space<smem>>
    %c0_0 = arith.constant 0 : index
    %c0_1 = arith.constant 0 : index
    %c0_2 = arith.constant 0 : index
    %1 = vector.load %arg3[%c0_0, %c0_1, %c0_2] : memref<1x8x2xf32, #tpu.memory_space<vmem>>, vector<1x8x2xf32>
    %2 = vector.extract_strided_slice %1 {offsets = [0, 0, 0], sizes = [1, 8, 1], strides = [1, 1, 1]} : vector<1x8x2xf32> to vector<1x8x1xf32>
    %3 = vector.extract_strided_slice %1 {offsets = [0, 0, 1], sizes = [1, 8, 1], strides = [1, 1, 1]} : vector<1x8x2xf32> to vector<1x8x1xf32>
    %c0_3 = arith.constant 0 : index
    %c0_4 = arith.constant 0 : index
    %c0_5 = arith.constant 0 : index
    %4 = vector.load %arg4[%c0_3, %c0_4, %c0_5] : memref<1x1x8xf32, #tpu.memory_space<vmem>>, vector<1x1x8xf32>
    %5 = vector.broadcast %2 : vector<1x8x1xf32> to vector<1x8x8xf32>
    %6 = vector.broadcast %4 : vector<1x1x8xf32> to vector<1x8x8xf32>
    %7 = arith.mulf %5, %6 : vector<1x8x8xf32>
    %8 = vector.broadcast %3 : vector<1x8x1xf32> to vector<1x8x8xf32>
    %9 = arith.addf %7, %8 : vector<1x8x8xf32>
    %10 = math.exp %9 : vector<1x8x8xf32>
    %cst = arith.constant dense<0.000000e+00> : vector<1x8xf32>
    %11 = vector.multi_reduction <add>, %10, %cst [2] : vector<1x8x8xf32> to vector<1x8xf32>
    %12 = vector.shape_cast %11 : vector<1x8xf32> to vector<1x8x1xf32>
    %13 = tpu.reciprocal %12 {approx = true} : vector<1x8x1xf32> -> vector<1x8x1xf32>
    %14 = vector.broadcast %0 : f32 to vector<1x8x1xf32>
    %15 = arith.mulf %14, %13 : vector<1x8x1xf32>
    %16 = arith.truncf %15 : vector<1x8x1xf32> to vector<1x8x1xbf16>
    %c0_6 = arith.constant 0 : index
    %c0_7 = arith.constant 0 : index
    %17 = vector.load %arg5[%c0_6, %c0_7] : memref<8x8xbf16, #tpu.memory_space<vmem>>, vector<8x8xbf16>
    %18 = arith.truncf %10 : vector<1x8x8xf32> to vector<1x8x8xbf16>
    %19 = vector.broadcast %16 : vector<1x8x1xbf16> to vector<1x8x8xbf16>
    %20 = arith.mulf %18, %19 : vector<1x8x8xbf16>
    %21 = vector.shape_cast %17 : vector<8x8xbf16> to vector<1x8x8xbf16>
    %22 = arith.addf %21, %20 : vector<1x8x8xbf16>
    %c0_8 = arith.constant 0 : index
    %c0_9 = arith.constant 0 : index
    %c0_10 = arith.constant 0 : index
    %23 = vector.load %arg6[%c0_8, %c0_9, %c0_10] : memref<1x8x16xbf16, #tpu.memory_space<vmem>>, vector<1x8x16xbf16>
    "tpu.trace_start"() <{level = 10 : i32, message = "bqn,bnd->bqd"}> : () -> ()
    %cst_11 = arith.constant dense<0.000000e+00> : vector<1x8x16xf32>
    %24 = tpu.matmul %22, %23, %cst_11 {dimension_numbers = #tpu.dot_dimension_numbers<[2], [1], [1], [2], [0, 0, 0, 1, 1, 2], [0], [0]>} : vector<1x8x8xbf16>, vector<1x8x16xbf16>, vector<1x8x16xf32> -> vector<1x8x16xf32>
    "tpu.trace_stop"() : () -> ()
    %c0_12 = arith.constant 0 : index
    %c0_13 = arith.constant 0 : index
    %c0_14 = arith.constant 0 : index
    %25 = vector.load %arg7[%c0_12, %c0_13, %c0_14] : memref<1x8x16xf32, #tpu.memory_space<vmem>>, vector<1x8x16xf32>
    tpu.vector_store %arg7[%c0_12, %c0_13, %c0_14], %24 {strides = array<i32>} : memref<1x8x16xf32, #tpu.memory_space<vmem>>, vector<1x8x16xf32>,
    return
  }
  func.func @transform_0(%arg0: i32, %arg1: i32) -> i32 {
    %c0_i32 = arith.constant 0 : i32
    %c0_i32_0 = arith.constant 0 : i32
    return %c0_i32 : i32
  }
  func.func @transform_1(%arg0: i32, %arg1: i32) -> (i32, i32, i32) {
    %c0_i32 = arith.constant 0 : i32
    %c0_i32_0 = arith.constant 0 : i32
    return %arg1, %arg0, %c0_i32 : i32, i32, i32
  }
  func.func @transform_2(%arg0: i32, %arg1: i32) -> (i32, i32, i32) {
    %c0_i32 = arith.constant 0 : i32
    %c0_i32_0 = arith.constant 0 : i32
    %c0_i32_1 = arith.constant 0 : i32
    return %arg1, %c0_i32, %c0_i32_0 : i32, i32, i32
  }
  func.func @transform_3(%arg0: i32, %arg1: i32) -> (i32, i32) {
    %c0_i32 = arith.constant 0 : i32
    %c0_i32_0 = arith.constant 0 : i32
    return %arg0, %c0_i32 : i32, i32
  }
  func.func @transform_4(%arg0: i32, %arg1: i32) -> (i32, i32, i32) {
    %c0_i32 = arith.constant 0 : i32
    %c0_i32_0 = arith.constant 0 : i32
    %c0_i32_1 = arith.constant 0 : i32
    return %arg1, %c0_i32, %c0_i32_0 : i32, i32, i32
  }
  func.func @transform_5(%arg0: i32, %arg1: i32) -> (i32, i32, i32) {
    %c0_i32 = arith.constant 0 : i32
    %c0_i32_0 = arith.constant 0 : i32
    return %arg1, %arg0, %c0_i32 : i32, i32, i32
  }
}

</mosaic_0001>

<bundles_post_ra>
// kernel: tpu_custom_call.1
= control target key start
LH: loop header
LB: loop body
LE: loop exit
PB: predicated region body
PF: predicated region fallthrough
CT: control target
= control target key end

     0   :  { %s780_s0 = inlined_call_operand.<no memory space> [shape: f32[1], index: 0, kind: input, shape index: {}]   ;;  %s781_s1 = inlined_call_operand.vmem [shape: f32[2,8,2], index: 1, kind: input, shape index: {}]   ;;  %s782_s2 = inlined_call_operand.vmem [shape: f32[2,1,8], index: 2, kind: input, shape index: {}]   ;;  %s783_s3 = inlined_call_operand.vmem [shape: bf16[8,8], index: 3, kind: input, shape index: {}]   ;;  %s784_s4 = inlined_call_operand.vmem [shape: bf16[2,8,16], index: 4, kind: input, shape index: {}]   ;;  %s785_s5 = inlined_call_operand.hbm [shape: f32[2,8,16], index: 5, kind: output, shape index: {}]  }
   0x1   :  { %10 = sst [smem:[#allocation2]] %s780_s0 }
   0x2   :  { %11 = vsyncpa [#allocation4], 0 }
   0x3   :  { %13 = vsyncpa [#allocation4 + $0x1], 0  ;;  %s672_s20 = smov 0   ;;  %s674_s21 = smov 0  }
   0x4   :  { %s676_s22 = smov 0   ;;  %s678_s23 = smov 0  }
   0x5   :  { %s680_s24 = smov 0   ;;  %s682_s25 = smov 0  }
   0x6 LB: > { %s479_s0 = sadd.s32 4294967295, %s635_s25   ;;  %s480_s26 = sadd.s32 4294967294, %s635_s25   ;;  %s635_s25 = sphi %s682_s25, %s19_s25   ;;  %s631_s24 = sphi %s680_s24, %s792_s24   ;;  %s627_s23 = sphi %s678_s23, %s791_s23   ;;  %s623_s22 = sphi %s676_s22, %s790_s22   ;;  %s619_s21 = sphi %s674_s21, %s789_s21   ;;  %s615_s20 = sphi %s672_s20, %s788_s20  }
   0x7   : > { %s28_s27 = sadd.s32 1, %s631_s24  ;;  %s167_s28 = sadd.s32 1, %s623_s22 }
   0x8   : > { %p29_p0 = scmp.ge.s32.totalorder %s28_s27, 2  ;;  %p177_p1 = scmp.ne.s32.totalorder %s623_s22, %s619_s21 }
   0x9   : > { %p178_p2 = scmp.eq.s32.totalorder %s479_s0, 1  ;;  %p183_p3 = scmp.ne.s32.totalorder %s619_s21, %s615_s20 }
   0xa   : > { %s794_s27 = smov (%p29_p0, %s28_s27), 0  ;;  %p184_p5 = scmp.eq.s32.totalorder %s480_s26, 1 }
   0xb   : > { %p712_p4 = por %p178_p2, %p177_p1  ;;  %s162_s30 = ssub.s32 %s631_s24, %s794_s27 }
   0xc   : > { %p484_p6 = scmp.ge.s32.totalorder %s635_s25, 1  ;;  %p165_p7 = scmp.eq.s32.totalorder %s162_s30, 0 }
   0xd   : > { %p719_p8 = por %p184_p5, %p183_p3  ;;  %p235_p9 = scmp.lt.s32.totalorder %s635_s25, 3 }
   0xe   : > { %s725_s7 = scalar_select %p165_p7, %s623_s22, %s167_s28  }
   0xf   : > { %p236_p10 = pnand %p484_p6, %p235_p9 }
  0x10   : > { %p276_p11 = scmp.lt.s32.totalorder (!%p236_p10), %s627_s23, 1  ;;  %s295_s0 = sld [smem:[#allocation2]] (!%p236_p10) }
  0x11   : > { %239 = sbr.rel (%p236_p10) target bundleno = 436 (0x1b4), region = 40  ;;  %s273_s30 = sand.u32 (!%p236_p10), 1, %s619_s21  }
  0x16   : > { %v637_v0 = vmov 0   ;;  %s277_s8 = scalar_select %p276_p11, %s627_s23, 1  ;;  %v638_v2 = vmov 1   ;;  %vm314_vm0 = vcmask 64512   ;;  %vm336_vm1 = vcmask 1043456  }
  0x17   : > { %550 = vset.pattern.permute.xlu0 %v637_v0  ;;  %v319_v14 = vstv %s295_s0  ;;  %v322_v21 = vld [vmem:[%s783_s3] sm:$0xf]  ;;  %vm353_vm2 = vcmask 130048   ;;  %s577_s0 = scalar_lea.hbm %s785_s5, 16 }
  0x18   : > { %s486_s9 = sshll.u32 %s277_s8, 3  ;;  %s285_s12 = scalar_lea.vmem %s782_s2, %s277_s8  ;;  %v328_v24 = vunpack.c.l.bf16 %v322_v21 }
  0x19   : > { %s282_s15 = scalar_lea.vmem %s781_s1, %s486_s9  ;;  %v552_v4 = vld [vmem:[%s285_s12] ss:$0 sm:$0xff]  ;;  %s487_s16 = sshll.u32 %s277_s8, 2 }
  0x1a   : > { %v296_v1 = vld [vmem:[%s282_s15] sm:$0xff]  ;;  %s293_s19 = scalar_lea.vmem %s784_s4, %s487_s16  ;;  %s490_s8 = sshll.u32 %s627_s23, 3 }
  0x1b   : > { %300 = vperm.xlu0 %550, %v296_v1   ;;  %v332_v11 = vld [vmem:[%s293_s19] sm:$0xf]  ;;  %s485_s9 = sshll.u32 %s273_s30, 3  ;;  %s367_s12 = scalar_lea.hbm %s785_s5, %s490_s8 }
  0x1c   : > { %v338_v12 = vsel %vm336_vm1, %v332_v11, 0  ;;  %s275_s13 = scalar_lea.vmem [#allocation3], %s485_s9  ;;  %s371_s15 = sshll.u32 %s367_s12, 4  ;;  %s372_s15 = int_to_ptr.hbm [resolvable:$true] %s371_s15 }
  0x1d   : > { %347 = vmatpush.bf16.msra.mxu0 %v338_v12  ;;  %s369_s14 = sshll.u32 %s275_s13, 4  ;;  %s356_s16 = scalar_lea.sflag [#allocation4], %s273_s30  ;;  %s370_s14 = int_to_ptr.vmem [resolvable:$true] %s369_s14 }
  0x1e   : > { %s571_s17 = sshra.s32 %s372_s15, 4  ;;  %s572_s17 = int_to_ptr.hbm [resolvable:$true] %s571_s17 }
  0x1f   : > { %s573_s18 = scalar_lea.hbm %s572_s17, 8  ;;  %p578_p1 = scmp.lt.s32.totalorder %s572_s17, %s785_s5 }
  0x20   : > { %p574_p12 = scmp.ne.s32.totalorder %s572_s17, %s573_s18  ;;  %p579_p2 = scmp.lt.s32.totalorder %s577_s0, %s573_s18 }
  0x22   : > { %p575_p13 = pnand %p574_p12, %p712_p4  ;;  %p580_p3 = por %p579_p2, %p578_p1 }
  0x23   : > { %551 = vset.pattern.permute.xlu0 %v638_v2 }
  0x24   : > { %308 = vperm.xlu0 %551, %v296_v1   ;;  %p576_p0 = pneg %p575_p13 }
  0x26   : > { %p581_p5 = pnand %p580_p3, %p576_p0 }
  0x8d   : > { %v301_v3 = vpop.permute.xlu0 %300 }
  0x8e   : > { %v306_v5 = vmul.f32 %v552_v4, %v301_v3 }
  0x96   : > { %v309_v6 = vpop.permute.xlu0 %308 }
  0x97   : > { %v311_v7 = vadd.f32 %v309_v6, %v306_v5 }
  0x99   : > { %v312_v8 = vmul.f32 1.442695, %v311_v7 }
  0x9b   : > { %553 = vpow2.f32 %v312_v8 }
  0xa1   : > { %v554_v9 = vpop.eup %553 }
  0xa2   : > { %v315_v10 = vsel %vm314_vm0, %v554_v9, 0.0  ;;  %v323_v16 = vpack.c.bf16 %v554_v9, %v554_v9 }
  0xa3   : > { %316 = vadd.xlane.f32.xlu1 %v315_v10 }
  0xa4   : > { %v324_v19 = vunpack.c.l.bf16 %v323_v16 }
 0x116   : > { %v317_v13 = vpop.xlane.xlu1 %316 }
 0x117   : > { %555 = vrcp.f32 %v317_v13 }
 0x11d   : > { %v556_v15 = vpop.eup %555 }
 0x11e   : > { %v320_v17 = vmul.f32 %v556_v15, %v319_v14 }
 0x120   : > { %v321_v18 = vpack.c.bf16 %v320_v17, %v320_v17 }
 0x122   : > { %v325_v20 = vunpack.c.l.bf16 %v321_v18 }
 0x124   : > { %v326_v22 = vmul.f32 %v325_v20, %v324_v19 }
 0x126   : > { %v327_v23 = vpack.c.bf16 %v326_v22, %v326_v22 }
 0x128   : > { %v329_v25 = vunpack.c.l.bf16 %v327_v23 }
 0x12a   : > { %v330_v26 = vadd.f32 %v329_v25, %v328_v24 }
 0x12c   : > { %v331_v27 = vpack.c.bf16 %v330_v26, %v330_v26 }
 0x12e   : > { %488 = vmatmul.msk.bf16.vlgmr.msra.gmra.mxu0 %vm314_vm0, %v331_v27 }
 0x1ab   : > { %v349_v28 = vpop.f32.mrf.mxu0 }
 0x1ac   : > { %354 = vst.msk [vmem:[%s275_s13] sm:$0xff] %vm353_vm2, %v349_v28 }
 0x1ad   : > { %584 = shalt.err (!%p581_p5)
}
 0x1ae   : > { %493 = dma.vmem_to_hbm [thread:$0]  (%p712_p4), %s370_s14, 128, %s372_s15, %s356_s16  }
 0x1b3   : > { %v351_v29 = vpop.f32.mrf.mxu0 }
 0x1b4 PF: > { %p499_p6 = scmp.ge.s32.totalorder %s635_s25, 2  ;;  %s383_s30 = sand.u32 1, %s615_s20  }
 0x1b5   : > { %s384_s8 = scalar_lea.sflag [#allocation4], %s383_s30 }
 0x1b6   : > { %p496_p7 = pnand %p499_p6, %p719_p8 }
 0x1b8   : > { %p497_p9 = pneg %p496_p7 }
 0x1ba   : > { %610 = dma.done.wait (%p497_p9), %s384_s8, 128  }
 0x1bb   : > { %612 = vsyncadd (%p497_p9), %s384_s8, 4294967168  ;;  %s19_s25 = sadd.s32 1, %s635_s25   ;;  %s788_s20 = smov %s619_s21 }
 0x1bc   : > { %p16_p10 = scmp.ge.s32.totalorder %s19_s25, 4   ;;  %s789_s21 = smov %s623_s22 }
 0x1bd   : > { %s790_s22 = smov %s725_s7  ;;  %s791_s23 = smov %s631_s24 }
 0x1be   : > { %s792_s24 = smov %s794_s27  ;;  %18 = sbr.rel (!%p16_p10) target bundleno = 6 (0x6), region = 84 }
 0x1c3   :  { %390 = vsyncpa [#allocation4], 1 }
 0x1c4   :  { %392 = vsyncpa [#allocation4 + $0x1], 1 }

</bundles_post_ra>
